<compile_context>
chip_gen: v5e
topology: v5e:2x2
jax: 0.10.0
libtpu: 0.0.40
codegen_flags: <defaults>
</compile_context>

<pallas_src>
import functools
import math

import jax
import jax.numpy as jnp
from jax.experimental import pallas as pl
from jax.experimental.pallas import tpu as pltpu

NEG_SLOPE = 0.01   # nn.LeakyReLU default negative_slope
BN_EPS = 1e-5      # nn.BatchNorm2d default eps
LANE = 128
SUBLANE = 8


def _round_up(x, m):
    return ((x + m - 1) // m) * m


# ---------------------------------------------------------------------------
# Pallas kernel: one (tm, tn) tile of  leaky_relu(x @ w + b)
# ---------------------------------------------------------------------------
def _conv_mm_kernel(x_ref, w_ref, b_ref, o_ref, acc_ref):
    """x: (tm, tk) bf16 im2col patches, w: (tk, tn) bf16 (BN scale folded in),
    b: (1, tn) f32 folded BN bias, acc: (tm, tn) f32 VMEM scratch.
    Grid = (M/tm, N/tn, K/tk); the K axis is a sequential reduction."""
    k = pl.program_id(2)

    @pl.when(k == 0)
    def _():
        acc_ref[...] = jnp.zeros_like(acc_ref)

    acc_ref[...] += jnp.dot(x_ref[...], w_ref[...],
                            preferred_element_type=jnp.float32)

    @pl.when(k == pl.num_programs(2) - 1)
    def _():
        y = acc_ref[...] + b_ref[...]
        y = jnp.where(y >= 0.0, y, NEG_SLOPE * y)   # LeakyReLU epilogue
        o_ref[...] = y.astype(o_ref.dtype)


def matmul_bias_leaky(x, w, bias, *, tm=128, tn=128):
    """x: (M, K) bf16, w: (K, N) bf16, bias: (1, N) f32 -> (M, N) f32.
    M, N, K are pre-padded so blocks are (8, 128)-aligned."""
    M, K = x.shape
    K2, N = w.shape
    assert K == K2 and M % tm == 0 and N % tn == 0 and K % SUBLANE == 0

    # If K is a multiple of 128 we can tile (and pipeline) the reduction;
    # otherwise the (8,128) BlockSpec rule requires the full padded K extent.
    tk = min(K, 512) if K % LANE == 0 else K
    grid = (M // tm, N // tn, K // tk)

    return pl.pallas_call(
        _conv_mm_kernel,
        out_shape=jax.ShapeDtypeStruct((M, N), jnp.float32),
        grid_spec=pltpu.PrefetchScalarGridSpec(
            num_scalar_prefetch=0,
            grid=grid,
            in_specs=[
                pl.BlockSpec((tm, tk), lambda i, j, k: (i, k)),
                pl.BlockSpec((tk, tn), lambda i, j, k: (k, j)),
                pl.BlockSpec((1, tn), lambda i, j, k: (0, j)),
            ],
            out_specs=pl.BlockSpec((tm, tn), lambda i, j, k: (i, j)),
            scratch_shapes=[pltpu.VMEM((tm, tn), jnp.float32)],
        ),
        compiler_params=pltpu.CompilerParams(
            dimension_semantics=("parallel", "parallel", "arbitrary")),
    )(x, w, bias)


# ---------------------------------------------------------------------------
# Conv lowering glue (JAX-side im2col; the matmul is the Pallas kernel)
# ---------------------------------------------------------------------------
def _im2col(x, kh, kw, stride=1, pad=0):
    """x: (N, H, W, C) -> (N*OH*OW, kh*kw*C) patches, K-order = (kh, kw, cin)."""
    N, H, W, C = x.shape
    if pad:
        x = jnp.pad(x, ((0, 0), (pad, pad), (pad, pad), (0, 0)))
    Hp, Wp = H + 2 * pad, W + 2 * pad
    OH = (Hp - kh) // stride + 1
    OW = (Wp - kw) // stride + 1
    if kh == 1 and kw == 1 and stride == 1:          # 1x1 conv fast path
        return x.reshape(N * OH * OW, C), (N, OH, OW)
    cols = []
    for i in range(kh):
        for j in range(kw):
            cols.append(x[:, i:i + stride * OH:stride, j:j + stride * OW:stride, :])
    patches = jnp.concatenate(cols, axis=-1)          # (N, OH, OW, kh*kw*C)
    return patches.reshape(N * OH * OW, kh * kw * C), (N, OH, OW)


def convolution_forward(params, x_nchw):
    """LeakyReLU(BatchNorm2d(Conv2d(x)))  — eval-mode BN folded into w / bias.

    x_nchw: (N, Cin, H, W) float32 (PyTorch layout).  Returns (N, Cout, OH, OW).
    """
    w = params["w_folded"]        # (kh, kw, cin, cout) with BN scale folded in
    bias = params["bias_folded"]  # (cout,) = (conv_b - mean)*scale + beta
    kh, kw, cin, cout = w.shape

    x = jnp.transpose(x_nchw, (0, 2, 3, 1))           # NHWC
    patches, (N, OH, OW) = _im2col(x, kh, kw, stride=1, pad=0)
    M, K = patches.shape

    tm, tn = 128, 128
    M_pad = _round_up(M, tm)
    K_pad = _round_up(K, SUBLANE)
    C_pad = _round_up(cout, tn)

    # bf16 MXU operands (f32 accumulation in-kernel); zero-pad for alignment.
    x_p = jnp.pad(patches, ((0, M_pad - M), (0, K_pad - K))).astype(jnp.bfloat16)
    w_p = jnp.pad(w.reshape(K, cout),
                  ((0, K_pad - K), (0, C_pad - cout))).astype(jnp.bfloat16)
    b_p = jnp.pad(bias, (0, C_pad - cout)).reshape(1, C_pad).astype(jnp.float32)

    out = matmul_bias_leaky(x_p, w_p, b_p, tm=tm, tn=tn)   # (M_pad, C_pad) f32
    out = out[:M, :cout].reshape(N, OH, OW, cout)
    return jnp.transpose(out, (0, 3, 1, 2))            # back to NCHW


# ---------------------------------------------------------------------------
# Deterministic synthetic parameters (shapes follow nn.Conv2d / nn.BatchNorm2d)
# ---------------------------------------------------------------------------
def make_convolution_params(cin=3, cout=64, k=3, seed=42):
    key = jax.random.PRNGKey(seed)
    kw_key, kb_key = jax.random.split(key)
    fan_in = cin * k * k
    bound = 1.0 / math.sqrt(fan_in)
    w = jax.random.uniform(kw_key, (k, k, cin, cout), jnp.float32, -bound, bound)
    conv_b = jax.random.uniform(kb_key, (cout,), jnp.float32, -bound, bound)

    # BatchNorm2d default init / running stats (eval mode).
    gamma = jnp.ones((cout,), jnp.float32)
    beta = jnp.zeros((cout,), jnp.float32)
    running_mean = jnp.zeros((cout,), jnp.float32)
    running_var = jnp.ones((cout,), jnp.float32)

    scale = gamma / jnp.sqrt(running_var + BN_EPS)
    bias_folded = (conv_b - running_mean) * scale + beta
    w_folded = w * scale[None, None, None, :]          # fold BN scale into weights

    return {
        "w_raw": w, "b_raw": conv_b,
        "gamma": gamma, "beta": beta,
        "mean": running_mean, "var": running_var,
        "w_folded": w_folded, "bias_folded": bias_folded,
    }


if __name__ == "__main__":
    params = make_convolution_params(cin=3, cout=64, k=3, seed=42)

    # PyTorch input layout: (N, C, H, W) = (2, 3, 16, 16)
    x = jax.random.normal(jax.random.PRNGKey(0), (2, 3, 16, 16), jnp.float32)

    fwd = jax.jit(convolution_forward)
    y = jax.block_until_ready(fwd(params, x))

    assert y.shape == (2, 64, 14, 14), y.shape
    assert bool(jnp.all(jnp.isfinite(y)))

    # Pure-JAX f32 reference of the un-folded module (Conv -> eval BN -> LeakyReLU).
    w_oihw = jnp.transpose(params["w_raw"], (3, 2, 0, 1))        # (cout, cin, kh, kw)
    ref = jax.lax.conv_general_dilated(
        x, w_oihw, window_strides=(1, 1), padding="VALID",
        dimension_numbers=("NCHW", "OIHW", "NCHW"))
    ref = ref + params["b_raw"][None, :, None, None]
    ref = (ref - params["mean"][None, :, None, None]) / jnp.sqrt(
        params["var"][None, :, None, None] + BN_EPS)
    ref = ref * params["gamma"][None, :, None, None] + params["beta"][None, :, None, None]
    ref = jnp.where(ref >= 0.0, ref, NEG_SLOPE * ref)

    max_err = float(jnp.max(jnp.abs(y - ref)))
    assert max_err < 5e-2, max_err    # bf16 MXU operands -> loose tolerance

    print("KERNEL_OK")
</pallas_src>

<mosaic_0001>
module attributes {stable_mosaic.version = 11 : i64} {
  func.func @_conv_mm_kernel(%arg0: i32, %arg1: i32, %arg2: i32, %arg3: memref<128x32xbf16, #tpu.memory_space<vmem>>, %arg4: memref<32x128xbf16, #tpu.memory_space<vmem>>, %arg5: memref<1x128xf32, #tpu.memory_space<vmem>>, %arg6: memref<128x128xf32, #tpu.memory_space<vmem>>, %arg7: memref<128x128xf32, #tpu.memory_space<vmem>>) attributes {dimension_semantics = [#tpu.dimension_semantics<parallel>, #tpu.dimension_semantics<parallel>, #tpu.dimension_semantics<arbitrary>], iteration_bounds = array<i64: 4, 1, 1>, scalar_prefetch = 0 : i64, scratch_operands = 1 : i64, tpu.core_type = #tpu.core_type<tc>, window_params = [{transform_indices = @transform_0, window_bounds = array<i64: 128, 32>}, {transform_indices = @transform_1, window_bounds = array<i64: 32, 128>}, {transform_indices = @transform_2, window_bounds = array<i64: 1, 128>}, {transform_indices = @transform_3, window_bounds = array<i64: 128, 128>}]} {
    %c0_i32 = arith.constant 0 : i32
    %0 = arith.cmpi eq, %arg2, %c0_i32 : i32
    %1 = arith.extui %0 : i1 to i32
    %c0_i32_0 = arith.constant 0 : i32
    %2 = arith.cmpi ne, %1, %c0_i32_0 : i32
    scf.if %2 {
      %cst_10 = arith.constant 0.000000e+00 : f32
      %12 = vector.broadcast %cst_10 : f32 to vector<128x128xf32>
      %c0_11 = arith.constant 0 : index
      %c0_12 = arith.constant 0 : index
      %13 = vector.load %arg7[%c0_11, %c0_12] : memref<128x128xf32, #tpu.memory_space<vmem>>, vector<128x128xf32>
      tpu.vector_store %arg7[%c0_11, %c0_12], %12 {strides = array<i32>} : memref<128x128xf32, #tpu.memory_space<vmem>>, vector<128x128xf32>,
    } else {
    }
    %c0 = arith.constant 0 : index
    %c0_1 = arith.constant 0 : index
    %3 = vector.load %arg7[%c0, %c0_1] : memref<128x128xf32, #tpu.memory_space<vmem>>, vector<128x128xf32>
    %c0_2 = arith.constant 0 : index
    %c0_3 = arith.constant 0 : index
    %4 = vector.load %arg3[%c0_2, %c0_3] : memref<128x32xbf16, #tpu.memory_space<vmem>>, vector<128x32xbf16>
    %c0_4 = arith.constant 0 : index
    %c0_5 = arith.constant 0 : index
    %5 = vector.load %arg4[%c0_4, %c0_5] : memref<32x128xbf16, #tpu.memory_space<vmem>>, vector<32x128xbf16>
    %cst = arith.constant dense<0.000000e+00> : vector<128x128xf32>
    %6 = tpu.matmul %4, %5, %cst {dimension_numbers = #tpu.dot_dimension_numbers<[1], [0], [0], [1], [0, 0, 1, 1], [], []>} : vector<128x32xbf16>, vector<32x128xbf16>, vector<128x128xf32> -> vector<128x128xf32>
    %7 = arith.addf %3, %6 : vector<128x128xf32>
    %c0_6 = arith.constant 0 : index
    %c0_7 = arith.constant 0 : index
    %8 = vector.load %arg7[%c0_6, %c0_7] : memref<128x128xf32, #tpu.memory_space<vmem>>, vector<128x128xf32>
    tpu.vector_store %arg7[%c0_6, %c0_7], %7 {strides = array<i32>} : memref<128x128xf32, #tpu.memory_space<vmem>>, vector<128x128xf32>,
    %c0_i32_8 = arith.constant 0 : i32
    %9 = arith.cmpi eq, %arg2, %c0_i32_8 : i32
    %10 = arith.extui %9 : i1 to i32
    %c0_i32_9 = arith.constant 0 : i32
    %11 = arith.cmpi ne, %10, %c0_i32_9 : i32
    scf.if %11 {
      %c0_10 = arith.constant 0 : index
      %c0_11 = arith.constant 0 : index
      %12 = vector.load %arg7[%c0_10, %c0_11] : memref<128x128xf32, #tpu.memory_space<vmem>>, vector<128x128xf32>
      %c0_12 = arith.constant 0 : index
      %c0_13 = arith.constant 0 : index
      %13 = vector.load %arg5[%c0_12, %c0_13] : memref<1x128xf32, #tpu.memory_space<vmem>>, vector<1x128xf32>
      %14 = vector.broadcast %13 : vector<1x128xf32> to vector<128x128xf32>
      %15 = arith.addf %12, %14 : vector<128x128xf32>
      %cst_14 = arith.constant 0.000000e+00 : f32
      %16 = vector.broadcast %cst_14 : f32 to vector<128x128xf32>
      %17 = arith.cmpf oge, %15, %16 : vector<128x128xf32>
      %cst_15 = arith.constant 0.00999999977 : f32
      %18 = vector.broadcast %cst_15 : f32 to vector<128x128xf32>
      %19 = arith.mulf %18, %15 : vector<128x128xf32>
      %20 = arith.select %17, %15, %19 : vector<128x128xi1>, vector<128x128xf32>
      %c0_16 = arith.constant 0 : index
      %c0_17 = arith.constant 0 : index
      %21 = vector.load %arg6[%c0_16, %c0_17] : memref<128x128xf32, #tpu.memory_space<vmem>>, vector<128x128xf32>
      tpu.vector_store %arg6[%c0_16, %c0_17], %20 {strides = array<i32>} : memref<128x128xf32, #tpu.memory_space<vmem>>, vector<128x128xf32>,
    } else {
    }
    return
  }
  func.func @transform_0(%arg0: i32, %arg1: i32, %arg2: i32) -> (i32, i32) {
    %c0_i32 = arith.constant 0 : i32
    return %arg0, %arg2 : i32, i32
  }
  func.func @transform_1(%arg0: i32, %arg1: i32, %arg2: i32) -> (i32, i32) {
    %c0_i32 = arith.constant 0 : i32
    return %arg2, %arg1 : i32, i32
  }
  func.func @transform_2(%arg0: i32, %arg1: i32, %arg2: i32) -> (i32, i32) {
    %c0_i32 = arith.constant 0 : i32
    %c0_i32_0 = arith.constant 0 : i32
    return %c0_i32, %arg1 : i32, i32
  }
  func.func @transform_3(%arg0: i32, %arg1: i32, %arg2: i32) -> (i32, i32) {
    %c0_i32 = arith.constant 0 : i32
    return %arg0, %arg1 : i32, i32
  }
}

</mosaic_0001>

<bundles_post_ra>
// kernel: convolution_forward.1
= control target key start
LH: loop header
LB: loop body
LE: loop exit
PB: predicated region body
PF: predicated region fallthrough
CT: control target
= control target key end

     0   :  { %s834_s12 = smov 0   ;;  %s836_s13 = smov 0   ;;  %s924_s0 = inlined_call_operand.vmem [shape: bf16[512,32], index: 0, kind: input, shape index: {}]   ;;  %s925_s1 = inlined_call_operand.vmem [shape: bf16[32,128], index: 1, kind: input, shape index: {}]   ;;  %s926_s2 = inlined_call_operand.vmem [shape: f32[1,128], index: 2, kind: input, shape index: {}]   ;;  %s927_s3 = inlined_call_operand.vmem [shape: f32[512,128], index: 3, kind: output, shape index: {}]  }
   0x1   :  { %s838_s14 = smov 0  }
   0x2 LB: > { %s32_s15 = sadd.s32 1, %s808_s13  ;;  %p694_p0 = scmp.ge.s32.totalorder %s812_s14, 1  ;;  %s812_s14 = sphi %s838_s14, %s13_s14   ;;  %s808_s13 = sphi %s836_s13, %s929_s13   ;;  %s804_s12 = sphi %s834_s12, %s928_s12  }
   0x3   : > { %p34_p1 = scmp.ge.s32.totalorder %s32_s15, 4  ;;  %p188_p2 = scmp.lt.s32.totalorder %s812_s14, 5 }
   0x5   : > { %s931_s15 = smov (%p34_p1, %s32_s15), 0  ;;  %p189_p3 = pnand %p694_p0, %p188_p2 }
   0x6   : > { %s695_s18 = sshll.u32 (!%p189_p3), %s804_s12, 4 }
   0x7   : > { %192 = sbr.rel (%p189_p3) target bundleno = 184 (0xb8), region = 32  ;;  %p230_p4 = scmp.lt.s32.totalorder (!%p189_p3), %s695_s18, 63 }
   0xc   : > { %v758_v0 = vld [vmem:[%s925_s1 + $0x8] sm:$0xff]  ;;  %v757_v1 = vld [vmem:[%s925_s1] sm:$0xff]  ;;  %s933_s18 = smov (!%p230_p4, %s695_s18), 63  ;;  %vm368_vm0 = vcmask 261120  }
   0xd   : > { %399 = vmatpush.bf16.msra.mxu0 %v758_v0  ;;  %759 = vmatpush.bf16.msra.mxu1 %v758_v0  ;;  %s696_s21 = sshll.u32 %s933_s18, 2  ;;  %v875_v10 = vld [vmem:[%s926_s2] ss:$0 sm:$0xff]  ;;  %s698_s27 = sshll.u32 %s933_s18, 3 }
   0xe   : > { %760 = vmatpush.bf16.msra.mxu2 %v758_v0  ;;  %761 = vmatpush.bf16.msra.mxu3 %v758_v0  ;;  %s236_s24 = scalar_lea.vmem %s924_s0, %s696_s21  ;;  %s883_s30 = scalar_lea.vmem %s927_s3, %s698_s27 }
   0xf   : > { %v749_v2 = vld [vmem:[%s236_s24] sm:$0xff]  ;;  %v751_v3 = vld [vmem:[%s236_s24 + $0x10] sm:$0xff]  ;;  %v750_v6 = vld [vmem:[%s236_s24 + $0x8] sm:$0xff] }
  0x10   : > { %v753_v4 = vld [vmem:[%s236_s24 + $0x20] sm:$0xff]  ;;  %v755_v5 = vld [vmem:[%s236_s24 + $0x30] sm:$0xff]  ;;  %v752_v7 = vld [vmem:[%s236_s24 + $0x18] sm:$0xff] }
  0x11   : > { %400 = vmatpush.bf16.msra.mxu0 %v757_v1  ;;  %762 = vmatpush.bf16.msra.mxu1 %v757_v1  ;;  %v754_v8 = vld [vmem:[%s236_s24 + $0x28] sm:$0xff]  ;;  %v756_v9 = vld [vmem:[%s236_s24 + $0x38] sm:$0xff] }
  0x12   : > { %763 = vmatpush.bf16.msra.mxu2 %v757_v1  ;;  %764 = vmatpush.bf16.msra.mxu3 %v757_v1 }
  0x14   : > { %739 = vmatmul.msk.bf16.vlgmr.msra.gmra.mxu0 %vm368_vm0, %v749_v2  ;;  %741 = vmatmul.msk.bf16.vlgmr.msra.gmra.mxu1 %vm368_vm0, %v751_v3 }
  0x15   : > { %743 = vmatmul.msk.bf16.vlgmr.msra.gmra.mxu2 %vm368_vm0, %v753_v4  ;;  %745 = vmatmul.msk.bf16.vlgmr.msra.gmra.mxu3 %vm368_vm0, %v755_v5 }
  0x24   : > { %740 = vmatmul.msk.bf16.gmra.mxu0 %vm368_vm0, %v750_v6  ;;  %742 = vmatmul.msk.bf16.gmra.mxu1 %vm368_vm0, %v752_v7 }
  0x25   : > { %744 = vmatmul.msk.bf16.gmra.mxu2 %vm368_vm0, %v754_v8  ;;  %746 = vmatmul.msk.bf16.gmra.mxu3 %vm368_vm0, %v756_v9 }
  0x91   : > { %v402_v11 = vpop.f32.mrf.mxu0  ;;  %v412_v12 = vpop.f32.mrf.mxu1 }
  0x92   : > { %v497_v13 = vadd.f32 %v875_v10, %v402_v11  ;;  %v501_v14 = vadd.f32 %v875_v10, %v412_v12 }
  0x94   : > { %vm513_vm1 = vcmp.ge.f32.partialorder %v497_v13, 0.0  ;;  %v529_v15 = vmul.f32 0.01, %v497_v13  ;;  %vm517_vm2 = vcmp.ge.f32.partialorder %v501_v14, 0.0  ;;  %v533_v16 = vmul.f32 0.01, %v501_v14 }
  0x96   : > { %v545_v17 = vsel %vm513_vm1, %v497_v13, %v529_v15  ;;  %v549_v18 = vsel %vm517_vm2, %v501_v14, %v533_v16 }
  0x97   : > { %561 = vst [vmem:[%s883_s30] sm:$0xff] %v545_v17 }
  0x98   : > { %565 = vst [vmem:[%s883_s30 + $0x20] sm:$0xff] %v549_v18  ;;  %v422_v19 = vpop.f32.mrf.mxu2  ;;  %v432_v20 = vpop.f32.mrf.mxu3 }
  0x99   : > { %v505_v21 = vadd.f32 %v875_v10, %v422_v19  ;;  %v509_v22 = vadd.f32 %v875_v10, %v432_v20  ;;  %v404_v23 = vpop.f32.mrf.mxu0  ;;  %v414_v24 = vpop.f32.mrf.mxu1 }
  0x9a   : > { %v498_v25 = vadd.f32 %v875_v10, %v404_v23  ;;  %v502_v26 = vadd.f32 %v875_v10, %v414_v24 }
  0x9b   : > { %vm521_vm3 = vcmp.ge.f32.partialorder %v505_v21, 0.0  ;;  %v537_v27 = vmul.f32 0.01, %v505_v21  ;;  %vm525_vm4 = vcmp.ge.f32.partialorder %v509_v22, 0.0  ;;  %v541_v28 = vmul.f32 0.01, %v509_v22 }
  0x9c   : > { %vm514_vm5 = vcmp.ge.f32.partialorder %v498_v25, 0.0  ;;  %v530_v29 = vmul.f32 0.01, %v498_v25  ;;  %vm518_vm6 = vcmp.ge.f32.partialorder %v502_v26, 0.0  ;;  %v534_v30 = vmul.f32 0.01, %v502_v26 }
  0x9d   : > { %v553_v31 = vsel %vm521_vm3, %v505_v21, %v537_v27  ;;  %v557_v32 = vsel %vm525_vm4, %v509_v22, %v541_v28 }
  0x9e   : > { %569 = vst [vmem:[%s883_s30 + $0x40] sm:$0xff] %v553_v31  ;;  %v546_v33 = vsel %vm514_vm5, %v498_v25, %v530_v29  ;;  %v550_v34 = vsel %vm518_vm6, %v502_v26, %v534_v30 }
  0x9f   : > { %573 = vst [vmem:[%s883_s30 + $0x60] sm:$0xff] %v557_v32 }
  0xa0   : > { %562 = vst [vmem:[%s883_s30 + $0x8] sm:$0xff] %v546_v33  ;;  %v424_v35 = vpop.f32.mrf.mxu2  ;;  %v434_v36 = vpop.f32.mrf.mxu3 }
  0xa1   : > { %566 = vst [vmem:[%s883_s30 + $0x28] sm:$0xff] %v550_v34  ;;  %v506_v37 = vadd.f32 %v875_v10, %v424_v35  ;;  %v510_v38 = vadd.f32 %v875_v10, %v434_v36  ;;  %v407_v39 = vpop.f32.mrf.mxu0  ;;  %v417_v40 = vpop.f32.mrf.mxu1 }
  0xa2   : > { %v499_v41 = vadd.f32 %v875_v10, %v407_v39  ;;  %v503_v42 = vadd.f32 %v875_v10, %v417_v40 }
  0xa3   : > { %vm522_vm7 = vcmp.ge.f32.partialorder %v506_v37, 0.0  ;;  %v538_v43 = vmul.f32 0.01, %v506_v37  ;;  %vm526_vm8 = vcmp.ge.f32.partialorder %v510_v38, 0.0  ;;  %v542_v44 = vmul.f32 0.01, %v510_v38 }
  0xa4   : > { %vm515_vm9 = vcmp.ge.f32.partialorder %v499_v41, 0.0  ;;  %v531_v45 = vmul.f32 0.01, %v499_v41  ;;  %vm519_vm10 = vcmp.ge.f32.partialorder %v503_v42, 0.0  ;;  %v535_v46 = vmul.f32 0.01, %v503_v42 }
  0xa5   : > { %v554_v47 = vsel %vm522_vm7, %v506_v37, %v538_v43  ;;  %v558_v48 = vsel %vm526_vm8, %v510_v38, %v542_v44 }
  0xa6   : > { %570 = vst [vmem:[%s883_s30 + $0x48] sm:$0xff] %v554_v47  ;;  %v547_v49 = vsel %vm515_vm9, %v499_v41, %v531_v45  ;;  %v551_v50 = vsel %vm519_vm10, %v503_v42, %v535_v46 }
  0xa7   : > { %574 = vst [vmem:[%s883_s30 + $0x68] sm:$0xff] %v558_v48 }
  0xa8   : > { %563 = vst [vmem:[%s883_s30 + $0x10] sm:$0xff] %v547_v49  ;;  %v427_v51 = vpop.f32.mrf.mxu2  ;;  %v437_v52 = vpop.f32.mrf.mxu3 }
  0xa9   : > { %567 = vst [vmem:[%s883_s30 + $0x30] sm:$0xff] %v551_v50  ;;  %v507_v53 = vadd.f32 %v875_v10, %v427_v51  ;;  %v511_v54 = vadd.f32 %v875_v10, %v437_v52  ;;  %v409_v55 = vpop.f32.mrf.mxu0  ;;  %v419_v56 = vpop.f32.mrf.mxu1 }
  0xaa   : > { %v500_v57 = vadd.f32 %v875_v10, %v409_v55  ;;  %v504_v58 = vadd.f32 %v875_v10, %v419_v56 }
  0xab   : > { %vm523_vm11 = vcmp.ge.f32.partialorder %v507_v53, 0.0  ;;  %v539_v59 = vmul.f32 0.01, %v507_v53  ;;  %vm527_vm12 = vcmp.ge.f32.partialorder %v511_v54, 0.0  ;;  %v543_v60 = vmul.f32 0.01, %v511_v54 }
  0xac   : > { %vm516_vm13 = vcmp.ge.f32.partialorder %v500_v57, 0.0  ;;  %v532_v61 = vmul.f32 0.01, %v500_v57  ;;  %vm520_vm14 = vcmp.ge.f32.partialorder %v504_v58, 0.0  ;;  %v536_v62 = vmul.f32 0.01, %v504_v58 }
  0xad   : > { %v555_v63 = vsel %vm523_vm11, %v507_v53, %v539_v59  ;;  %v559_v0 = vsel %vm527_vm12, %v511_v54, %v543_v60 }
  0xae   : > { %571 = vst [vmem:[%s883_s30 + $0x50] sm:$0xff] %v555_v63  ;;  %v548_v1 = vsel %vm516_vm13, %v500_v57, %v532_v61  ;;  %v552_v2 = vsel %vm520_vm14, %v504_v58, %v536_v62 }
  0xaf   : > { %575 = vst [vmem:[%s883_s30 + $0x70] sm:$0xff] %v559_v0 }
  0xb0   : > { %564 = vst [vmem:[%s883_s30 + $0x18] sm:$0xff] %v548_v1  ;;  %v429_v3 = vpop.f32.mrf.mxu2  ;;  %v439_v4 = vpop.f32.mrf.mxu3 }
  0xb1   : > { %568 = vst [vmem:[%s883_s30 + $0x38] sm:$0xff] %v552_v2  ;;  %v508_v5 = vadd.f32 %v875_v10, %v429_v3  ;;  %v512_v6 = vadd.f32 %v875_v10, %v439_v4 }
  0xb3   : > { %vm524_vm15 = vcmp.ge.f32.partialorder %v508_v5, 0.0  ;;  %v540_v7 = vmul.f32 0.01, %v508_v5  ;;  %vm528_vm0 = vcmp.ge.f32.partialorder %v512_v6, 0.0  ;;  %v544_v8 = vmul.f32 0.01, %v512_v6 }
  0xb5   : > { %v556_v9 = vsel %vm524_vm15, %v508_v5, %v540_v7  ;;  %v560_v11 = vsel %vm528_vm0, %v512_v6, %v544_v8 }
  0xb6   : > { %572 = vst [vmem:[%s883_s30 + $0x58] sm:$0xff] %v556_v9 }
  0xb7   : > { %576 = vst [vmem:[%s883_s30 + $0x78] sm:$0xff] %v560_v11 }
  0xb8 PF: > { %s13_s14 = sadd.s32 1, %s812_s14   ;;  %s928_s12 = smov %s808_s13 }
  0xb9   : > { %p10_p5 = scmp.ge.s32.totalorder %s13_s14, 6   ;;  %s929_s13 = smov %s931_s15 }
  0xbb   :  { %12 = sbr.rel (!%p10_p5) target bundleno = 2 (0x2), region = 76 }

</bundles_post_ra>
